<compile_context>
chip_gen: v7x
topology: tpu7x:2x2x1
jax: 0.10.0
libtpu: 0.0.40
codegen_flags: <defaults>
</compile_context>

<pallas_src>
import functools

import jax
import jax.numpy as jnp
from jax.experimental import pallas as pl
from jax.experimental.pallas import tpu as pltpu


# ---------------------------------------------------------------------------
# Fused per-(batch, head) cross-attention kernel:
#   q = x @ Wq_h ; k = c @ Wk_h ; v = c @ Wv_h
#   o_h = softmax(q k^T * scale [+ mask_bias]) @ v
# bf16 MXU operands, f32 accumulation; softmax math in f32.
# ---------------------------------------------------------------------------
def _fused_attn_kernel(x_ref, c_ref, wq_ref, wk_ref, wv_ref, o_ref, *, scale):
    xb = x_ref[0]                                    # (N, C)  bf16
    cb = c_ref[0]                                    # (L, C)  bf16
    q = jnp.dot(xb, wq_ref[...], preferred_element_type=jnp.float32)   # (N, Dh)
    k = jnp.dot(cb, wk_ref[...], preferred_element_type=jnp.float32)   # (L, Dh)
    v = jnp.dot(cb, wv_ref[...], preferred_element_type=jnp.float32)   # (L, Dh)
    # q @ k^T without materializing a transpose.
    s = jax.lax.dot_general(
        q.astype(jnp.bfloat16), k.astype(jnp.bfloat16),
        (((1,), (1,)), ((), ())), preferred_element_type=jnp.float32
    ) * scale                                        # (N, L) f32
    s = s - jnp.max(s, axis=-1, keepdims=True)
    p = jnp.exp(s)
    p = p * pl.reciprocal(jnp.sum(p, axis=-1, keepdims=True), approx=True)
    o = jnp.dot(p.astype(jnp.bfloat16), v.astype(jnp.bfloat16),
                preferred_element_type=jnp.float32)  # (N, Dh)
    o_ref[0] = o.astype(o_ref.dtype)


def _fused_attn_masked_kernel(x_ref, c_ref, wq_ref, wk_ref, wv_ref, bias_ref,
                              o_ref, *, scale):
    xb = x_ref[0]
    cb = c_ref[0]
    q = jnp.dot(xb, wq_ref[...], preferred_element_type=jnp.float32)
    k = jnp.dot(cb, wk_ref[...], preferred_element_type=jnp.float32)
    v = jnp.dot(cb, wv_ref[...], preferred_element_type=jnp.float32)
    s = jax.lax.dot_general(
        q.astype(jnp.bfloat16), k.astype(jnp.bfloat16),
        (((1,), (1,)), ((), ())), preferred_element_type=jnp.float32
    ) * scale
    s = s + bias_ref[0]                              # (1, L) additive bias
    s = s - jnp.max(s, axis=-1, keepdims=True)
    p = jnp.exp(s)
    p = p * pl.reciprocal(jnp.sum(p, axis=-1, keepdims=True), approx=True)
    o = jnp.dot(p.astype(jnp.bfloat16), v.astype(jnp.bfloat16),
                preferred_element_type=jnp.float32)
    o_ref[0] = o.astype(o_ref.dtype)


def _fused_attention(xq, xc, wq, wkv, *, scale, num_heads, bias=None):
    """xq: (B,N,C) bf16, xc: (B,L,C) bf16, wq: (C,C) bf16, wkv: (C,2C) bf16,
    bias: optional (B,1,L) f32 additive mask bias.  Returns (B,N,C) bf16 with
    per-head outputs packed along the channel dim (head h -> cols [h*Dh,(h+1)*Dh))."""
    b, n, cdim = xq.shape
    _, l, _ = xc.shape
    h = num_heads
    dh = cdim // h

    x_spec = pl.BlockSpec((1, n, cdim), lambda bi, hi: (bi, 0, 0))
    c_spec = pl.BlockSpec((1, l, cdim), lambda bi, hi: (bi, 0, 0))
    wq_spec = pl.BlockSpec((cdim, dh), lambda bi, hi: (0, hi))
    wk_spec = pl.BlockSpec((cdim, dh), lambda bi, hi: (0, hi))
    wv_spec = pl.BlockSpec((cdim, dh), lambda bi, hi: (0, h + hi))
    o_spec = pl.BlockSpec((1, n, dh), lambda bi, hi: (bi, 0, hi))

    flops = 2 * b * h * (n * cdim * dh + 2 * l * cdim * dh + 2 * n * l * dh)
    cost = pl.CostEstimate(
        flops=flops,
        transcendentals=b * h * n * l,
        bytes_accessed=2 * (b * n * cdim + b * l * cdim + 3 * cdim * cdim
                            + b * n * cdim),
    )
    cparams = pltpu.CompilerParams(
        dimension_semantics=("parallel", "parallel"))
    out_shape = jax.ShapeDtypeStruct((b, n, cdim), jnp.bfloat16)

    # TODO(synk): for long contexts (large L) switch to a flash-style online
    # softmax with an "arbitrary" L grid axis and VMEM m/l/acc scratch; the
    # full (N,L) score tile here is fine for the short context lengths this
    # module is used with.
    if bias is None:
        kern = functools.partial(_fused_attn_kernel, scale=scale)
        return pl.pallas_call(
            kern,
            out_shape=out_shape,
            grid=(b, h),
            in_specs=[x_spec, c_spec, wq_spec, wk_spec, wv_spec],
            out_specs=o_spec,
            compiler_params=cparams,
            cost_estimate=cost,
        )(xq, xc, wq, wkv, wkv)

    bias_spec = pl.BlockSpec((1, 1, l), lambda bi, hi: (bi, 0, 0))
    kern = functools.partial(_fused_attn_masked_kernel, scale=scale)
    return pl.pallas_call(
        kern,
        out_shape=out_shape,
        grid=(b, h),
        in_specs=[x_spec, c_spec, wq_spec, wk_spec, wv_spec, bias_spec],
        out_specs=o_spec,
        compiler_params=cparams,
        cost_estimate=cost,
    )(xq, xc, wq, wkv, wkv, bias)


# ---------------------------------------------------------------------------
# Output projection:  y = x @ Wproj + bproj,  rows x output-columns tiled.
# ---------------------------------------------------------------------------
def _proj_kernel(x_ref, w_ref, b_ref, o_ref):
    acc = jnp.dot(x_ref[...], w_ref[...], preferred_element_type=jnp.float32)
    o_ref[...] = (acc + b_ref[...]).astype(o_ref.dtype)


def _pick_tiles(m, k, nout, *, in_bytes=2, out_bytes=4, budget=12 << 20):
    """Largest (tm, tn) divisor tiles whose double-buffered blocks fit a
    conservative VMEM budget (safe for v5e 16 MiB scoped default and v7x)."""
    def divisors(dim, cands):
        d = [t for t in cands if dim % t == 0]
        return d if d else [dim]

    tn_cands = divisors(nout, (512, 256, 128))
    tm_cands = divisors(m, (512, 256, 128, 64, 32, 16, 8))

    def vmem(tm, tn):
        return 2 * (tm * k * in_bytes + k * tn * in_bytes
                    + tn * 4 + tm * tn * out_bytes)

    for tn in tn_cands:
        for tm in tm_cands:
            if vmem(tm, tn) <= budget:
                return tm, tn
    return tm_cands[-1], tn_cands[-1]


def _out_proj(x, w, bias, out_dtype):
    """x: (M, K) bf16, w: (K, Nout) bf16, bias: (1, Nout) f32 -> (M, Nout)."""
    m, k = x.shape
    _, nout = w.shape
    tm, tn = _pick_tiles(m, k, nout)
    grid = (m // tm, nout // tn)

    # TODO(synk): for very large K add an "arbitrary" K-reduction grid axis
    # with an f32 VMEM accumulator; full-K blocks are fine at these dims.
    cost = pl.CostEstimate(
        flops=2 * m * k * nout,
        transcendentals=0,
        bytes_accessed=2 * (m * k + k * nout) + 4 * (nout + m * nout),
    )
    return pl.pallas_call(
        _proj_kernel,
        out_shape=jax.ShapeDtypeStruct((m, nout), out_dtype),
        grid=grid,
        in_specs=[
            pl.BlockSpec((tm, k), lambda i, j: (i, 0)),
            pl.BlockSpec((k, tn), lambda i, j: (0, j)),
            pl.BlockSpec((1, tn), lambda i, j: (0, j)),
        ],
        out_specs=pl.BlockSpec((tm, tn), lambda i, j: (i, j)),
        compiler_params=pltpu.CompilerParams(
            dimension_semantics=("parallel", "parallel")),
        cost_estimate=cost,
    )(x, w, bias)


# ---------------------------------------------------------------------------
# Full CrossAttention forward
# ---------------------------------------------------------------------------
def cross_attention(x, c, params, *, num_heads, mask=None):
    """Pallas equivalent of CrossAttention(dim, num_heads).forward(x, c, mask).

    x: (B, N, C) queries, c: (B, L, C) context, mask: optional (B, L) keep-mask.
    params: wq (C,C), wkv (C,2C), wproj (C,C), bproj (C,) — weights stored as
            (in_features, out_features), i.e. already transposed vs. nn.Linear.
    """
    b, n, cdim = x.shape
    _, l, _ = c.shape
    assert cdim % num_heads == 0, "dim should be divisible by num_heads"
    dh = cdim // num_heads
    assert num_heads == 1 or dh % 128 == 0, (
        "per-head BlockSpec column slicing needs head_dim % 128 == 0")
    scale = dh ** -0.5

    # bf16 MXU operands (f32 accumulation happens inside the kernels).
    cdt = jnp.bfloat16
    xb = x.astype(cdt)
    cb = c.astype(cdt)
    wq = params["wq"].astype(cdt)
    wkv = params["wkv"].astype(cdt)
    wproj = params["wproj"].astype(cdt)
    bproj = params["bproj"].astype(jnp.float32).reshape(1, cdim)

    bias = None
    if mask is not None:
        # Additive f32 mask bias (0 keep / -1e30 drop), broadcast over queries.
        keep = mask.astype(jnp.float32) > 0.5
        bias = jnp.where(keep, 0.0, -1e30).astype(jnp.float32).reshape(b, 1, l)

    # TODO(synk): qkv_bias=True (per-head q/k/v bias add), qk_norm=True
    # (LayerNorm on q/k) and the two dropouts are identity at the module
    # defaults and are intentionally not implemented here.

    # Fused q/kv projection + attention; per-head output lands lane-dense in
    # a (B, N, C) slab (head h -> channel columns [h*Dh, (h+1)*Dh)).
    o = _fused_attention(xb, cb, wq, wkv, scale=scale, num_heads=num_heads,
                         bias=bias)                                   # bf16

    out = _out_proj(o.reshape(b * n, cdim), wproj, bproj, x.dtype)
    return out.reshape(b, n, cdim)


# ---------------------------------------------------------------------------
# Pure-JAX f32 reference mirroring the PyTorch forward (non-fused path).
# ---------------------------------------------------------------------------
def _reference(x, c, params, num_heads, mask=None):
    b, n, cdim = x.shape
    _, l, _ = c.shape
    dh = cdim // num_heads
    scale = dh ** -0.5
    hp = jax.lax.Precision.HIGHEST
    q = jnp.einsum("bnc,cd->bnd", x, params["wq"], precision=hp)
    kv = jnp.einsum("blc,cd->bld", c, params["wkv"], precision=hp)
    q = q.reshape(b, n, num_heads, dh).transpose(0, 2, 1, 3)
    kv = kv.reshape(b, l, 2, num_heads, dh).transpose(2, 0, 3, 1, 4)
    k, v = kv[0], kv[1]
    attn = jnp.einsum("bhnd,bhld->bhnl", q, k, precision=hp) * scale
    if mask is not None:
        attn = jnp.where(mask[:, None, None, :] > 0.5, attn, -1e30)
    attn = jax.nn.softmax(attn, axis=-1)
    o = jnp.einsum("bhnl,bhld->bhnd", attn, v, precision=hp)
    o = o.transpose(0, 2, 1, 3).reshape(b, n, cdim)
    out = jnp.einsum("bnc,cd->bnd", o, params["wproj"], precision=hp)
    return out + params["bproj"][None, None, :]


if __name__ == "__main__":
    key = jax.random.PRNGKey(0)
    B, N, L = 2, 16, 32
    DIM, HEADS = 256, 2          # head_dim = 128 -> lane-aligned per-head slices
    std = DIM ** -0.5

    k1, k2, k3, k4, k5, k6 = jax.random.split(key, 6)
    x = jax.random.normal(k1, (B, N, DIM), jnp.float32)
    c = jax.random.normal(k2, (B, L, DIM), jnp.float32)
    params = {
        "wq": jax.random.normal(k3, (DIM, DIM), jnp.float32) * std,
        "wkv": jax.random.normal(k4, (DIM, 2 * DIM), jnp.float32) * std,
        "wproj": jax.random.normal(k5, (DIM, DIM), jnp.float32) * std,
        "bproj": jax.random.normal(k6, (DIM,), jnp.float32) * std,
    }

    # bf16 MXU operands vs. an f32 HIGHEST-precision reference: allow ~bf16
    # rounding-level error.
    TOL = 5e-2

    # Unmasked path.
    out = jax.block_until_ready(cross_attention(x, c, params, num_heads=HEADS))
    ref = _reference(x, c, params, HEADS)
    assert out.shape == (B, N, DIM), out.shape
    assert jnp.allclose(out, ref, atol=TOL, rtol=TOL), float(
        jnp.max(jnp.abs(out - ref))
    )

    # Masked path.
    mask = (jax.random.uniform(jax.random.PRNGKey(1), (B, L)) > 0.3).astype(jnp.float32)
    mask = mask.at[:, 0].set(1.0)  # guarantee at least one valid key per row
    out_m = jax.block_until_ready(
        cross_attention(x, c, params, num_heads=HEADS, mask=mask)
    )
    ref_m = _reference(x, c, params, HEADS, mask=mask)
    assert jnp.allclose(out_m, ref_m, atol=TOL, rtol=TOL), float(
        jnp.max(jnp.abs(out_m - ref_m))
    )

    print("KERNEL_OK")
</pallas_src>

<mosaic_0001>
module attributes {stable_mosaic.version = 11 : i64} {
  func.func @_fused_attn_kernel(%arg0: i32, %arg1: i32, %arg2: memref<1x16x256xbf16, #tpu.memory_space<vmem>>, %arg3: memref<1x32x256xbf16, #tpu.memory_space<vmem>>, %arg4: memref<256x128xbf16, #tpu.memory_space<vmem>>, %arg5: memref<256x128xbf16, #tpu.memory_space<vmem>>, %arg6: memref<256x128xbf16, #tpu.memory_space<vmem>>, %arg7: memref<1x16x128xbf16, #tpu.memory_space<vmem>>) attributes {dimension_semantics = [#tpu.dimension_semantics<parallel>, #tpu.dimension_semantics<parallel>], iteration_bounds = array<i64: 2, 2>, scalar_prefetch = 0 : i64, scratch_operands = 0 : i64, tpu.core_type = #tpu.core_type<tc>, window_params = [{transform_indices = @transform_0, window_bounds = array<i64: 1, 16, 256>}, {transform_indices = @transform_1, window_bounds = array<i64: 1, 32, 256>}, {transform_indices = @transform_2, window_bounds = array<i64: 256, 128>}, {transform_indices = @transform_3, window_bounds = array<i64: 256, 128>}, {transform_indices = @transform_4, window_bounds = array<i64: 256, 128>}, {transform_indices = @transform_5, window_bounds = array<i64: 1, 16, 128>}]} {
    %c0 = arith.constant 0 : index
    %c0_0 = arith.constant 0 : index
    %c0_1 = arith.constant 0 : index
    %0 = vector.load %arg2[%c0, %c0_0, %c0_1] : memref<1x16x256xbf16, #tpu.memory_space<vmem>>, vector<1x16x256xbf16>
    %1 = vector.shape_cast %0 : vector<1x16x256xbf16> to vector<16x256xbf16>
    %c0_2 = arith.constant 0 : index
    %c0_3 = arith.constant 0 : index
    %c0_4 = arith.constant 0 : index
    %2 = vector.load %arg3[%c0_2, %c0_3, %c0_4] : memref<1x32x256xbf16, #tpu.memory_space<vmem>>, vector<1x32x256xbf16>
    %3 = vector.shape_cast %2 : vector<1x32x256xbf16> to vector<32x256xbf16>
    %c0_5 = arith.constant 0 : index
    %c0_6 = arith.constant 0 : index
    %4 = vector.load %arg4[%c0_5, %c0_6] : memref<256x128xbf16, #tpu.memory_space<vmem>>, vector<256x128xbf16>
    %cst = arith.constant dense<0.000000e+00> : vector<16x128xf32>
    %5 = tpu.matmul %1, %4, %cst {dimension_numbers = #tpu.dot_dimension_numbers<[1], [0], [0], [1], [0, 0, 1, 1], [], []>} : vector<16x256xbf16>, vector<256x128xbf16>, vector<16x128xf32> -> vector<16x128xf32>
    %c0_7 = arith.constant 0 : index
    %c0_8 = arith.constant 0 : index
    %6 = vector.load %arg5[%c0_7, %c0_8] : memref<256x128xbf16, #tpu.memory_space<vmem>>, vector<256x128xbf16>
    %cst_9 = arith.constant dense<0.000000e+00> : vector<32x128xf32>
    %7 = tpu.matmul %3, %6, %cst_9 {dimension_numbers = #tpu.dot_dimension_numbers<[1], [0], [0], [1], [0, 0, 1, 1], [], []>} : vector<32x256xbf16>, vector<256x128xbf16>, vector<32x128xf32> -> vector<32x128xf32>
    %c0_10 = arith.constant 0 : index
    %c0_11 = arith.constant 0 : index
    %8 = vector.load %arg6[%c0_10, %c0_11] : memref<256x128xbf16, #tpu.memory_space<vmem>>, vector<256x128xbf16>
    %cst_12 = arith.constant dense<0.000000e+00> : vector<32x128xf32>
    %9 = tpu.matmul %3, %8, %cst_12 {dimension_numbers = #tpu.dot_dimension_numbers<[1], [0], [0], [1], [0, 0, 1, 1], [], []>} : vector<32x256xbf16>, vector<256x128xbf16>, vector<32x128xf32> -> vector<32x128xf32>
    %10 = arith.truncf %5 : vector<16x128xf32> to vector<16x128xbf16>
    %11 = arith.truncf %7 : vector<32x128xf32> to vector<32x128xbf16>
    %cst_13 = arith.constant dense<0.000000e+00> : vector<16x32xf32>
    %12 = tpu.matmul %10, %11, %cst_13 {dimension_numbers = #tpu.dot_dimension_numbers<[1], [1], [0], [0], [0, 0, 1, 0], [], []>} : vector<16x128xbf16>, vector<32x128xbf16>, vector<16x32xf32> -> vector<16x32xf32>
    %cst_14 = arith.constant 0.0883883461 : f32
    %13 = vector.broadcast %cst_14 : f32 to vector<16x32xf32>
    %14 = arith.mulf %12, %13 : vector<16x32xf32>
    %cst_15 = arith.constant dense<0xFF800000> : vector<16xf32>
    %15 = vector.multi_reduction <maximumf>, %14, %cst_15 [1] : vector<16x32xf32> to vector<16xf32>
    %16 = vector.shape_cast %15 : vector<16xf32> to vector<16x1xf32>
    %17 = vector.broadcast %16 : vector<16x1xf32> to vector<16x32xf32>
    %18 = arith.subf %14, %17 : vector<16x32xf32>
    %19 = math.exp %18 : vector<16x32xf32>
    %cst_16 = arith.constant dense<0.000000e+00> : vector<16xf32>
    %20 = vector.multi_reduction <add>, %19, %cst_16 [1] : vector<16x32xf32> to vector<16xf32>
    %21 = vector.shape_cast %20 : vector<16xf32> to vector<16x1xf32>
    %22 = tpu.reciprocal %21 {approx = true} : vector<16x1xf32> -> vector<16x1xf32>
    %23 = vector.broadcast %22 : vector<16x1xf32> to vector<16x32xf32>
    %24 = arith.mulf %19, %23 : vector<16x32xf32>
    %25 = arith.truncf %24 : vector<16x32xf32> to vector<16x32xbf16>
    %26 = arith.truncf %9 : vector<32x128xf32> to vector<32x128xbf16>
    %cst_17 = arith.constant dense<0.000000e+00> : vector<16x128xf32>
    %27 = tpu.matmul %25, %26, %cst_17 {dimension_numbers = #tpu.dot_dimension_numbers<[1], [0], [0], [1], [0, 0, 1, 1], [], []>} : vector<16x32xbf16>, vector<32x128xbf16>, vector<16x128xf32> -> vector<16x128xf32>
    %28 = arith.truncf %27 : vector<16x128xf32> to vector<16x128xbf16>
    %c0_18 = arith.constant 0 : index
    %c0_19 = arith.constant 0 : index
    %c0_20 = arith.constant 0 : index
    %29 = vector.load %arg7[%c0_18, %c0_19, %c0_20] : memref<1x16x128xbf16, #tpu.memory_space<vmem>>, vector<1x16x128xbf16>
    %30 = vector.shape_cast %29 : vector<1x16x128xbf16> to vector<16x128xbf16>
    %31 = vector.shape_cast %28 : vector<16x128xbf16> to vector<1x16x128xbf16>
    tpu.vector_store %arg7[%c0_18, %c0_19, %c0_20], %31 {strides = array<i32>} : memref<1x16x128xbf16, #tpu.memory_space<vmem>>, vector<1x16x128xbf16>,
    return
  }
  func.func @transform_0(%arg0: i32, %arg1: i32) -> (i32, i32, i32) {
    %c0_i32 = arith.constant 0 : i32
    %c0_i32_0 = arith.constant 0 : i32
    %c0_i32_1 = arith.constant 0 : i32
    return %arg0, %c0_i32, %c0_i32_0 : i32, i32, i32
  }
  func.func @transform_1(%arg0: i32, %arg1: i32) -> (i32, i32, i32) {
    %c0_i32 = arith.constant 0 : i32
    %c0_i32_0 = arith.constant 0 : i32
    %c0_i32_1 = arith.constant 0 : i32
    return %arg0, %c0_i32, %c0_i32_0 : i32, i32, i32
  }
  func.func @transform_2(%arg0: i32, %arg1: i32) -> (i32, i32) {
    %c0_i32 = arith.constant 0 : i32
    %c0_i32_0 = arith.constant 0 : i32
    return %c0_i32, %arg1 : i32, i32
  }
  func.func @transform_3(%arg0: i32, %arg1: i32) -> (i32, i32) {
    %c0_i32 = arith.constant 0 : i32
    %c0_i32_0 = arith.constant 0 : i32
    return %c0_i32, %arg1 : i32, i32
  }
  func.func @transform_4(%arg0: i32, %arg1: i32) -> (i32, i32) {
    %c2_i32 = arith.constant 2 : i32
    %0 = arith.addi %c2_i32, %arg1 : i32
    %c0_i32 = arith.constant 0 : i32
    %c0_i32_0 = arith.constant 0 : i32
    return %c0_i32, %0 : i32, i32
  }
  func.func @transform_5(%arg0: i32, %arg1: i32) -> (i32, i32, i32) {
    %c0_i32 = arith.constant 0 : i32
    %c0_i32_0 = arith.constant 0 : i32
    return %arg0, %c0_i32, %arg1 : i32, i32, i32
  }
}

</mosaic_0001>

<bundles_post_ra>
// kernel: tpu_custom_call.1
= control target key start
LH: loop header
LB: loop body
LE: loop exit
PB: predicated region body
PF: predicated region fallthrough
CT: control target
= control target key end

     0   :  { %s2729_s0 = inlined_call_operand.hbm [shape: bf16[2,16,256], index: 0, kind: input, shape index: {}]   ;;  %s2730_s1 = inlined_call_operand.hbm [shape: bf16[2,32,256], index: 1, kind: input, shape index: {}]   ;;  %s2731_s2 = inlined_call_operand.hbm [shape: bf16[256,256], index: 2, kind: input, shape index: {}]   ;;  %s2732_s3 = inlined_call_operand.hbm [shape: bf16[256,512], index: 3, kind: input, shape index: {}]   ;;  %s2733_s4 = inlined_call_operand.hbm [shape: bf16[256,512], index: 4, kind: input, shape index: {}]   ;;  %s2734_s5 = inlined_call_operand.hbm [shape: bf16[2,16,256], index: 5, kind: output, shape index: {}]  }
   0x1   :  { %2765 = sst [smem:[#allocation38_spill]] %s2730_s1 }
   0x2   :  { %2766 = sst [smem:[#allocation39_spill]] %s2732_s3 }
   0x3   :  { %2767 = sst [smem:[#allocation40_spill]] %s2733_s4 }
   0x4   :  { %2768 = sst [smem:[#allocation41_spill]] %s2734_s5 }
   0x5   :  { %10 = vsyncpa [#allocation3], 0 }
   0x6   :  { %12 = vsyncpa [#allocation3 + $0x1], 0 }
   0x7   :  { %13 = vsyncpa [#allocation6], 0 }
   0x8   :  { %15 = vsyncpa [#allocation6 + $0x1], 0 }
   0x9   :  { %16 = vsyncpa [#allocation9], 0 }
   0xa   :  { %18 = vsyncpa [#allocation9 + $0x1], 0 }
   0xb   :  { %19 = vsyncpa [#allocation4], 0 }
   0xc   :  { %21 = vsyncpa [#allocation4 + $0x1], 0  ;;  %s2110_s18 = smov 0   ;;  %s2112_s19 = smov 0  }
   0xd   :  { %s2114_s20 = smov 0   ;;  %s2116_s21 = smov 0  }
   0xe   :  { %s2118_s22 = smov 0   ;;  %s2120_s23 = smov 0  }
   0xf   :  { %s2122_s24 = smov 0   ;;  %s2124_s25 = smov 0  }
  0x10   :  { %s2126_s26 = smov 0   ;;  %s2128_s27 = smov 0  }
  0x11   :  { %s2130_s28 = smov 0   ;;  %s2132_s29 = smov 0  }
  0x12   :  { %s2134_s30 = smov 0   ;;  %s2136_s6 = smov 0  }
  0x13   :  { %s2138_s7 = smov 0   ;;  %s2140_s8 = smov 0  }
  0x14   :  { %s2142_s9 = smov 0  }
  0x15 LB: > { %2769 = sst [smem:[#allocation18_spill]] %s1998_s18  ;;  %s2194_s10 = sadd.s32 4294967295, %s2062_s9   ;;  %s2062_s9 = sphi %s2142_s9, %s27_s9   ;;  %s2058_s8 = sphi %s2140_s8, %s2856_s8   ;;  %s2054_s7 = sphi %s2138_s7, %s2848_s7   ;;  %s2050_s6 = sphi %s2136_s6, %s2855_s6   ;;  %s2046_s30 = sphi %s2134_s30, %s2847_s30   ;;  %s2042_s29 = sphi %s2132_s29, %s2846_s29   ;;  %s2038_s28 = sphi %s2130_s28, %s2845_s28   ;;  %s2034_s27 = sphi %s2128_s27, %s2854_s27   ;;  %s2030_s26 = sphi %s2126_s26, %s2843_s26   ;;  %s2026_s25 = sphi %s2124_s25, %s2842_s25   ;;  %s2022_s24 = sphi %s2122_s24, %s2841_s24   ;;  %s2018_s23 = sphi %s2120_s23, %s2853_s23   ;;  %s2014_s22 = sphi %s2118_s22, %s2852_s22   ;;  %s2010_s21 = sphi %s2116_s21, %s2840_s21   ;;  %s2006_s20 = sphi %s2114_s20, %s2839_s20   ;;  %s2002_s19 = sphi %s2112_s19, %s2851_s19   ;;  %s1998_s18 = sphi %s2110_s18, %s2850_s18  }
  0x16   : > { %2770 = sst [smem:[#allocation19_spill]] %s2006_s20  ;;  %p53_p0 = scmp.ne.s32.totalorder %s2042_s29, %s2038_s28 }
  0x17   : > { %2771 = sst [smem:[#allocation20_spill]] %s2010_s21  ;;  %p2742_p1 = scmp.eq.s32.totalorder %s2062_s9, 0 }
  0x18   : > { %2772 = sst [smem:[#allocation21_spill]] %s2014_s22  ;;  %p59_p2 = scmp.ne.s32.totalorder %s2038_s28, %s2034_s27 }
  0x19   : > { %2773 = sst [smem:[#allocation22_spill]] %s2026_s25  ;;  %p2741_p3 = scmp.eq.s32.totalorder %s2194_s10, 0 }
  0x1a   : > { %2774 = sst [smem:[#allocation23_spill]] %s2030_s26  ;;  %p55_p5 = por %p2742_p1, %p53_p0 }
  0x1b   : > { %2775 = sst [smem:[#allocation24_spill]] %s2038_s28  ;;  %p2208_p6 = por %p2741_p3, %p59_p2 }
  0x1c   : > { %2776 = sst [smem:[#allocation25_spill]] %s2042_s29  ;;  %p2740_p7 = scmp.lt.s32.totalorder %s2062_s9, 4 }
  0x1d   : > { %2777 = sst [smem:[#allocation26_spill]] %s2046_s30  ;;  %s2214_s14 = sand.u32 1, %s2042_s29  }
  0x1e   : > { %2778 = sst [smem:[#allocation27_spill]] %s2050_s6  ;;  %p2218_p8 = pnand %p2740_p7, %p55_p5 }
  0x1f   : > { %2779 = sst [smem:[#allocation28_spill]] %s2054_s7  ;;  %s2746_s16 = sand.u32 1, %s2062_s9  }
  0x20   : > { %s2780_s13 = scalar_select %p2208_p6, 1, 0 }
  0x21   : > { %s1293_s17 = sshll.u32 %s2214_s14, 5  ;;  %s1372_s27 = sshll.u32 %s2058_s8, 9 }
  0x22   : > { %2781 = sst [smem:[#allocation29_spill]] %s2780_s13  ;;  %s2783_s1 = sld [smem:[#allocation38_spill]] }
  0x23   : > { %s242_s30 = scalar_lea.vmem [#allocation5], %s1293_s17  ;;  %s2234_s13 = scalar_lea.sflag [#allocation6], %s2746_s16 }
  0x24   : > { %s249_s6 = sshll.u32 %s242_s30, 4  ;;  %p2752_p10 = pneg %p2218_p8  ;;  %s2230_s6 = int_to_ptr.vmem [resolvable:$true] %s249_s6 }
  0x28   : > { %s2228_s5 = scalar_lea.hbm %s2783_s1, %s1372_s27  ;;  %s1730_s27 = scalar_lea.hbm %s2783_s1, 1024 }
  0x29   : > { %s1725_s28 = scalar_lea.hbm %s2228_s5, 512  ;;  %p1731_p13 = scmp.lt.u32.totalorder %s2228_s5, %s2783_s1 }
  0x2a   : > { %p1726_p9 = scmp.ne.s32.totalorder %s2228_s5, %s1725_s28  ;;  %p1732_p0 = scmp.lt.u32.totalorder %s1730_s27, %s1725_s28 }
  0x2b   : > { %p1734_p5 = scmp.lt.u32.totalorder %s1725_s28, %s2228_s5 }
  0x2c   : > { %p1728_p11 = pnand %p2752_p10, %p1726_p9  ;;  %p1733_p2 = por %p1732_p0, %p1731_p13 }
  0x2e   : > { %p1729_p12 = pneg %p1728_p11  ;;  %p1735_p7 = por %p1734_p5, %p1733_p2 }
  0x30   : > { %p1736_p4 = pnand %p1735_p7, %p1729_p12 }
  0x32   : > { %1739 = shalt.err (!%p1736_p4)
}
  0x33   : > { %s1740_s30 = scalar_lea.vmem %s2230_s6, 512  ;;  %s2064_s11 = smov [#allocation5]  }
  0x34   : > { %p1741_p9 = scmp.ne.s32.totalorder %s2230_s6, %s1740_s30  ;;  %s1745_s12 = sshll.u32 %s2064_s11, 4  ;;  %s1746_s12 = int_to_ptr.vmem [resolvable:$false] %s1745_s12 }
  0x35   : > { %s1747_s4 = scalar_lea.vmem %s1746_s12, 1024  ;;  %p1748_p1 = scmp.lt.s32.totalorder %s2230_s6, %s1746_s12 }
  0x36   : > { %p1743_p11 = pnand %p1741_p9, %p2752_p10  ;;  %p1749_p13 = scmp.lt.s32.totalorder %s1747_s4, %s1740_s30 }
  0x38   : > { %p1744_p3 = pneg %p1743_p11  ;;  %p1750_p0 = por %p1749_p13, %p1748_p1 }
  0x3a   : > { %p1751_p2 = pnand %p1750_p0, %p1744_p3 }
  0x3c   : > { %1754 = shalt.err (!%p1751_p2)
}
  0x3d   : > { %s2743_s28 = smov 128   ;;  %s2745_s27 = smov 8  }
  0x3e   : > { %1498 = dma.hbm_to_vmem [thread:$0]  (!%p2218_p8), %s2228_s5, 512, %s2230_s6, %s2234_s13, %s2743_s28, %s2743_s28, %s2745_s27  }
  0x3f   : > { %p1302_p1 = scmp.ge.s32.totalorder %s2062_s9, 1  ;;  %p318_p3 = scmp.lt.s32.totalorder %s2062_s9, 5 }
  0x40   : > { %s1287_s30 = sadd.s32 4294967294, %s2062_s9   ;;  %s36_s11 = sadd.s32 1, %s2054_s7 }
  0x41   : > { %p2267_p4 = pnand %p1302_p1, %p318_p3  ;;  %s98_s12 = sadd.s32 1, %s2030_s26 }
  0x42   : > { %p37_p7 = scmp.ge.s32.totalorder %s36_s11, 2  ;;  %p105_p12 = scmp.ne.s32.totalorder %s2030_s26, %s2026_s25 }
  0x43   : > { %s2784_s17 = scalar_select %p2267_p4, 1, 0 }
  0x44   : > { %p111_p5 = scmp.ne.s32.totalorder %s2026_s25, %s2022_s24  ;;  %s147_s4 = sadd.s32 2, %s2054_s7 }
  0x45   : > { %2785 = sst [smem:[#allocation30_spill]] %s2784_s17  ;;  %s2858_s11 = smov (%p37_p7, %s36_s11), 0 }
  0x46   : > { %2786 = sst [smem:[#allocation31_spill]] %s2858_s11  ;;  %s2787_s5 = sadd.s32 1, %s2058_s8 }
  0x47   : > { %s2860_s5 = smov (!%p37_p7, %s2787_s5), %s2058_s8  ;;  %s95_s6 = ssub.s32 %s2054_s7, %s2858_s11 }
  0x48   : > { %p2788_p9 = scmp.eq.s32.totalorder %s2062_s9, 0  ;;  %p41_p13 = scmp.ge.s32.totalorder %s2860_s5, 2 }
  0x49   : > { %p96_p0 = scmp.eq.s32.totalorder %s95_s6, 0  ;;  %p2790_p2 = scmp.eq.s32.totalorder %s2194_s10, 0 }
  0x4a   : > { %p2288_p11 = por %p105_p12, %p2788_p9  ;;  %s148_s27 = sadd.s32 2, %s2858_s11 }
  0x4b   : > { %p2294_p1 = por %p111_p5, %p2790_p2  ;;  %s2862_s5 = smov (%p41_p13, %s2860_s5), 0 }
  0x4c   : > { %2793 = sst [smem:[#allocation33_spill]] %s2862_s5  ;;  %s43_s1 = ssub.s32 %s2058_s8, %s2862_s5 }
  0x4d   : > { %s2791_s24 = scalar_select %p2294_p1, 1, 0 }
  0x4e   : > { %s2302_s16 = scalar_select %p96_p0, %s2030_s26, %s98_s12  }
  0x4f   : > { %2792 = sst [smem:[#allocation32_spill]] %s2791_s24  ;;  %s2306_s25 = ssub.s32 %s147_s4, %s148_s27 }
  0x50   : > { %2794 = sst [smem:[#allocation34_spill]] %s2302_s16  ;;  %p44_p3 = scmp.eq.s32.totalorder %s43_s1, 0 }
  0x51   : > { %s177_s17 = sor.u32 %s95_s6, %s43_s1  ;;  %s180_s21 = sadd.s32 1, %s2006_s20 }
  0x52   : > { %s2795_s24 = sadd.s32 1, %s2042_s29  ;;  %p178_p12 = scmp.eq.s32.totalorder %s177_s17, 0 }
  0x53   : > { %s2313_s22 = scalar_select %p44_p3, %s2042_s29, %s2795_s24  }
  0x54   : > { %p190_p5 = scmp.ne.s32.totalorder %s2006_s20, %s2002_s19  ;;  %p196_p9 = scmp.ne.s32.totalorder %s2002_s19, %s1998_s18 }
  0x55   : > { %2796 = sst [smem:[#allocation35_spill]] %s2313_s22  ;;  %p197_p13 = scmp.eq.s32.totalorder %s1287_s30, 3 }
  0x56   : > { %s2320_s12 = scalar_select %p178_p12, %s2006_s20, %s180_s21  }
  0x57   : > { %p2798_p0 = scmp.eq.s32.totalorder %s2194_s10, 3  ;;  %p2328_p10 = por %p197_p13, %p196_p9 }
  0x58   : > { %2797 = sst [smem:[#allocation36_spill]] %s2320_s12  ;;  %s261_s1 = sand.u32 1, %s2030_s26  }
  0x59   : > { %p2324_p2 = por %p2798_p0, %p190_p5  ;;  %s2334_s6 = sshll.u32 %s2054_s7, 6 }
  0x5a   : > { %s2800_s4 = scalar_select %p2328_p10, 1, 0 }
  0x5b   : > { %s2799_s27 = scalar_select %p2324_p2, 1, 0 }
  0x5c   : > { %2801 = sst [smem:[#allocation37_spill]] %s2800_s4  ;;  %s1296_s17 = sshll.u32 %s261_s1, 7 }
  0x5d   : > { %p2802_p3 = scmp.lt.s32.totalorder %s2062_s9, 4  ;;  %s263_s21 = scalar_lea.vmem [#allocation7], %s1296_s17 }
  0x5e   : > { %s269_s24 = sshll.u32 %s263_s21, 4  ;;  %s2804_s3 = sld [smem:[#allocation39_spill]]  ;;  %s2344_s24 = int_to_ptr.vmem [resolvable:$true] %s269_s24 }
  0x5f   : > { %p2340_p7 = pnand %p2802_p3, %p2288_p11  ;;  %s283_s28 = scalar_lea.vmem [#allocation8], %s1296_s17 }
  0x60   : > { %s289_s1 = sshll.u32 %s283_s28, 4  ;;  %s2805_s7 = sand.u32 1, %s2062_s9   ;;  %s2352_s1 = int_to_ptr.vmem [resolvable:$true] %s289_s1 }
  0x61   : > { %s2356_s29 = scalar_lea.sflag [#allocation9], %s2805_s7  ;;  %p2764_p12 = pneg %p2340_p7 }
  0x64   : > { %s2350_s22 = scalar_lea.hbm %s2804_s3, %s2334_s6  ;;  %s1760_s21 = scalar_lea.hbm %s2804_s3, 8192 }
  0x65   : > { %s1755_s16 = scalar_lea.hbm %s2350_s22, 2048  ;;  %p1761_p13 = scmp.lt.u32.totalorder %s2350_s22, %s2804_s3 }
  0x66   : > { %p1756_p11 = scmp.ne.s32.totalorder %s2350_s22, %s1755_s16  ;;  %p1762_p0 = scmp.lt.u32.totalorder %s1760_s21, %s1755_s16 }
  0x67   : > { %p1764_p10 = scmp.lt.u32.totalorder %s1755_s16, %s2350_s22 }
  0x68   : > { %p1758_p5 = pnand %p2764_p12, %p1756_p11  ;;  %p1763_p3 = por %p1762_p0, %p1761_p13 }
  0x6a   : > { %p1759_p9 = pneg %p1758_p5  ;;  %p1765_p2 = por %p1764_p10, %p1763_p3 }
  0x6c   : > { %p1766_p1 = pnand %p1765_p2, %p1759_p9 }
  0x6e   : > { %1769 = shalt.err (!%p1766_p1)
}
  0x6f   : > { %s1770_s7 = scalar_lea.vmem %s2352_s1, 2048  ;;  %s2067_s28 = smov [#allocation8]  }
  0x70   : > { %p1771_p11 = scmp.ne.s32.totalorder %s2352_s1, %s1770_s7  ;;  %s1775_s11 = sshll.u32 %s2067_s28, 4  ;;  %s1776_s11 = int_to_ptr.vmem [resolvable:$false] %s1775_s11 }
  0x71   : > { %s1777_s26 = scalar_lea.vmem %s1776_s11, 4096  ;;  %p1778_p4 = scmp.lt.s32.totalorder %s2352_s1, %s1776_s11 }
  0x72   : > { %p1773_p5 = pnand %p1771_p11, %p2764_p12  ;;  %p1779_p13 = scmp.lt.s32.totalorder %s1777_s26, %s1770_s7 }
  0x74   : > { %p1774_p6 = pneg %p1773_p5  ;;  %p1780_p0 = por %p1779_p13, %p1778_p4 }
  0x76   : > { %p1781_p10 = pnand %p1780_p0, %p1774_p6 }
  0x78   : > { %1784 = shalt.err (!%p1781_p10)
}
  0x79   : > { %s2068_s16 = smov 256   ;;  %s2069_s5 = smov 64  }
  0x7a   : > { %s2070_s21 = smov 4   ;;  %s1290_s17 = sshll.u32 %s2214_s14, 4 }
  0x7b   : > { %1504 = dma.hbm_to_vmem [thread:$0]  (!%p2340_p7), %s2350_s22, 2048, %s2352_s1, %s2356_s29, %s2068_s16, %s2069_s5, %s2070_s21  }
  0x7c   : > { %s1371_s7 = sshll.u32 %s2058_s8, 8  ;;  %s221_s3 = scalar_lea.vmem [#allocation2], %s1290_s17 }
  0x7d   : > { %s2392_s26 = scalar_lea.hbm %s2729_s0, %s1371_s7  ;;  %s228_s12 = sshll.u32 %s221_s3, 4  ;;  %s2400_s12 = int_to_ptr.vmem [resolvable:$true] %s228_s12 }
  0x7e   : > { %s2398_s18 = scalar_lea.hbm %s2731_s2, %s2334_s6  ;;  %s218_s22 = scalar_lea.sflag [#allocation3], %s2214_s14 }
  0x7f   : > { %s1785_s1 = scalar_lea.hbm %s2392_s26, 256  ;;  %p2806_p4 = pneg %p2218_p8 }
  0x80   : > { %p1786_p6 = scmp.ne.s32.totalorder %s2392_s26, %s1785_s1  ;;  %s1790_s11 = scalar_lea.hbm %s2729_s0, 512 }
  0x81   : > { %p1791_p9 = scmp.lt.u32.totalorder %s2392_s26, %s2729_s0  ;;  %p1792_p3 = scmp.lt.u32.totalorder %s1790_s11, %s1785_s1 }
  0x82   : > { %p1788_p1 = pnand %p1786_p6, %p2806_p4  ;;  %p1794_p5 = scmp.lt.u32.totalorder %s1785_s1, %s2392_s26 }
  0x83   : > { %p1793_p11 = por %p1792_p3, %p1791_p9 }
  0x84   : > { %p1789_p2 = pneg %p1788_p1 }
  0x85   : > { %p1795_p13 = por %p1794_p5, %p1793_p11 }
  0x87   : > { %p1796_p0 = pnand %p1795_p13, %p1789_p2 }
  0x89   : > { %1799 = shalt.err (!%p1796_p0)
}
  0x8a   : > { %s1800_s20 = scalar_lea.vmem %s2400_s12, 256  ;;  %p2807_p6 = pmov %p2806_p4 }
  0x8b   : > { %p1801_p10 = scmp.ne.s32.totalorder %s2400_s12, %s1800_s20  ;;  %s2071_s4 = smov [#allocation2]  }
  0x8c   : > { %s1805_s7 = sshll.u32 %s2071_s4, 4  ;;  %s1806_s7 = int_to_ptr.vmem [resolvable:$false] %s1805_s7 }
  0x8d   : > { %p1803_p4 = pnand %p1801_p10, %p2807_p6  ;;  %s1807_s28 = scalar_lea.vmem %s1806_s7, 512 }
  0x8e   : > { %p1808_p12 = scmp.lt.s32.totalorder %s2400_s12, %s1806_s7  ;;  %p1809_p9 = scmp.lt.s32.totalorder %s1807_s28, %s1800_s20 }
  0x8f   : > { %p1804_p1 = pneg %p1803_p4 }
  0x90   : > { %p1810_p3 = por %p1809_p9, %p1808_p12 }
  0x92   : > { %p1811_p11 = pnand %p1810_p3, %p1804_p1 }
  0x94   : > { %1814 = shalt.err (!%p1811_p11)
}
  0x95   : > { %s2808_s1 = smov 8   ;;  %s2809_s11 = smov 128  }
  0x96   : > { %1495 = dma.hbm_to_vmem [thread:$0]  (!%p2218_p8), %s2392_s26, 256, %s2400_s12, %s218_s22, %s2809_s11, %s2809_s11, %s2808_s1  }
  0x97   : > { %s1815_s17 = scalar_lea.hbm %s2398_s18, 2048  ;;  %p2810_p12 = pneg %p2340_p7 }
  0x98   : > { %p1816_p2 = scmp.ne.s32.totalorder %s2398_s18, %s1815_s17  ;;  %s1820_s20 = scalar_lea.hbm %s2731_s2, 4096 }
  0x99   : > { %p1821_p0 = scmp.lt.u32.totalorder %s2398_s18, %s2731_s2  ;;  %p1822_p10 = scmp.lt.u32.totalorder %s1820_s20, %s1815_s17 }
  0x9a   : > { %p1818_p5 = pnand %p1816_p2, %p2810_p12  ;;  %p1824_p4 = scmp.lt.u32.totalorder %s1815_s17, %s2398_s18 }
  0x9b   : > { %p1823_p6 = por %p1822_p10, %p1821_p0 }
  0x9c   : > { %p1819_p13 = pneg %p1818_p5 }
  0x9d   : > { %p1825_p1 = por %p1824_p4, %p1823_p6 }
  0x9f   : > { %p1826_p9 = pnand %p1825_p1, %p1819_p13 }
  0xa1   : > { %1829 = shalt.err (!%p1826_p9)
}
  0xa2   : > { %s1830_s12 = scalar_lea.vmem %s2344_s24, 2048  ;;  %p2811_p3 = pmov %p2810_p12 }
  0xa3   : > { %p1831_p8 = scmp.ne.s32.totalorder %s2344_s24, %s1830_s12  ;;  %s2072_s26 = smov [#allocation7]  }
  0xa4   : > { %s1835_s22 = sshll.u32 %s2072_s26, 4  ;;  %s1836_s22 = int_to_ptr.vmem [resolvable:$false] %s1835_s22 }
  0xa5   : > { %p1833_p11 = pnand %p1831_p8, %p2811_p3  ;;  %s1837_s7 = scalar_lea.vmem %s1836_s22, 4096 }
  0xa6   : > { %p1838_p12 = scmp.lt.s32.totalorder %s2344_s24, %s1836_s22  ;;  %p1839_p5 = scmp.lt.s32.totalorder %s1837_s7, %s1830_s12 }
  0xa7   : > { %p1834_p2 = pneg %p1833_p11 }
  0xa8   : > { %p1840_p0 = por %p1839_p5, %p1838_p12 }
  0xaa   : > { %p1841_p10 = pnand %p1840_p0, %p1834_p2 }
  0xac   : > { %1844 = shalt.err (!%p1841_p10)
}
  0xad   : > { %s2812_s28 = sld [smem:[#allocation21_spill]]  ;;  %s2813_s1 = sld [smem:[#allocation20_spill]] }
  0xae   : > { %1501 = dma.hbm_to_vmem [thread:$0]  (!%p2340_p7), %s2398_s18, 2048, %s2344_s24, %s2234_s13, %s2809_s11, %s2069_s5, %s2070_s21  }
  0xaf   : > { %s152_s30 = sadd.s32 1, %s2018_s23  ;;  %p2814_p13 = scmp.eq.s32.totalorder %s2306_s25, 0 }
  0xb0   : > { %s301_s15 = sand.u32 1, %s2018_s23   ;;  %s2815_s4 = sld [smem:[#allocation40_spill]] }
  0xb1   : > { %s2462_s17 = scalar_select %p2814_p13, %s2018_s23, %s152_s30  }
  0xb2   : > { %p2816_p1 = scmp.eq.s32.totalorder %s2062_s9, 0  ;;  %p2817_p8 = scmp.eq.s32.totalorder %s2194_s10, 0 }
  0xb3   : > { %p159_p6 = scmp.ne.s32.totalorder %s2018_s23, %s2812_s28  ;;  %p165_p4 = scmp.ne.s32.totalorder %s2812_s28, %s2813_s1 }
  0xb4   : > { %s1300_s26 = sshll.u32 %s301_s15, 7  ;;  %p2819_p7 = scmp.lt.s32.totalorder %s2062_s9, 4 }
  0xb5   : > { %p161_p9 = por %p159_p6, %p2816_p1  ;;  %p2477_p3 = por %p165_p4, %p2817_p8 }
  0xb6   : > { %s1170_s14 = scalar_lea.hbm %s2815_s4, %s2334_s6  ;;  %s303_s13 = scalar_lea.vmem [#allocation10], %s1300_s26 }
  0xb7   : > { %s2481_s18 = scalar_lea.hbm %s1170_s14, 128  ;;  %p2485_p11 = pnand %p2819_p7, %p161_p9 }
  0xb8   : > { %s310_s6 = sshll.u32 %s303_s13, 4  ;;  %s1875_s24 = scalar_lea.hbm %s1170_s14, 2176  ;;  %s2489_s6 = int_to_ptr.vmem [resolvable:$true] %s310_s6 }
  0xb9   : > { %p1846_p2 = scmp.ne.s32.totalorder %s2481_s18, %s1875_s24  ;;  %p1847_p12 = pneg %p2485_p11 }
  0xba   : > { %s1850_s7 = scalar_lea.hbm %s2815_s4, 8192  ;;  %p1851_p10 = scmp.lt.u32.totalorder %s2481_s18, %s2815_s4 }
  0xbb   : > { %p1848_p5 = pnand %p1847_p12, %p1846_p2  ;;  %p1852_p13 = scmp.lt.u32.totalorder %s1850_s7, %s1875_s24 }
  0xbc   : > { %p1854_p4 = scmp.lt.u32.totalorder %s1875_s24, %s2481_s18 }
  0xbd   : > { %p1849_p0 = pneg %p1848_p5  ;;  %p1853_p6 = por %p1852_p13, %p1851_p10 }
  0xbf   : > { %p1855_p1 = por %p1854_p4, %p1853_p6 }
  0xc1   : > { %p1856_p9 = pnand %p1855_p1, %p1849_p0 }
  0xc3   : > { %1859 = shalt.err (!%p1856_p9)
}
  0xc4   : > { %s1860_s30 = scalar_lea.vmem %s2489_s6, 2048  ;;  %s2073_s15 = smov [#allocation10]  }
  0xc5   : > { %p1861_p8 = scmp.ne.s32.totalorder %s2489_s6, %s1860_s30  ;;  %s1865_s3 = sshll.u32 %s2073_s15, 4  ;;  %s1866_s3 = int_to_ptr.vmem [resolvable:$false] %s1865_s3 }
  0xc6   : > { %s1867_s20 = scalar_lea.vmem %s1866_s3, 4096  ;;  %p1868_p5 = scmp.lt.s32.totalorder %s2489_s6, %s1866_s3 }
  0xc7   : > { %p1863_p7 = pnand %p1861_p8, %p1847_p12  ;;  %p1869_p10 = scmp.lt.s32.totalorder %s1867_s20, %s1860_s30 }
  0xc9   : > { %p1864_p2 = pneg %p1863_p7  ;;  %p1870_p13 = por %p1869_p10, %p1868_p5 }
  0xcb   : > { %p1871_p6 = pnand %p1870_p13, %p1864_p2 }
  0xcd   : > { %1874 = shalt.err (!%p1871_p6)
}
  0xce   : > { %1507 = dma.hbm_to_vmem [thread:$0]  (!%p2485_p11), %s2481_s18, 2048, %s2489_s6, %s2356_s29, %s2068_s16, %s2069_s5, %s2070_s21  }
  0xcf   : > { %s2821_s14 = sld [smem:[#allocation30_spill]] }
  0xd5   : > { %p2822_p12 = scmp.ne.s32.totalorder %s2821_s14, 0 }
  0xd6   : > { %s2823_s26 = sld [smem:[#allocation24_spill]] (!%p2822_p12)  ;;  %s2824_s13 = sld [smem:[#allocation29_spill]] (!%p2822_p12) }
  0xd7   : > { %322 = sbr.rel (%p2822_p12) target bundleno = 1282 (0x502), region = 40 }
  0xdc   : > { %s324_s24 = sand.u32 (!%p2822_p12), 1, %s2823_s26   ;;  %p2825_p0 = scmp.ne.s32.totalorder (!%p2822_p12), %s2824_s13, 0 }
  0xdd   : > { %s1303_s11 = sshll.u32 (!%p2822_p12), %s324_s24, 4  ;;  %s325_s22 = scalar_lea.sflag (!%p2822_p12), [#allocation3], %s324_s24 }
  0xde   : > { %s2522_s7 = scalar_lea.vmem [#allocation2], %s1303_s11 }
  0xdf   : > { %1973 = dma.done.wait (%p2825_p0), %s325_s22, 256  }
  0xe0   : > { %1975 = vsyncadd (%p2825_p0), %s325_s22, 4294967040  ;;  %s333_s25 = sand.u32 1, %s2194_s10   ;;  %s1304_s28 = sshll.u32 %s324_s24, 5 }
  0xe1   : > { %s334_s29 = scalar_lea.sflag [#allocation6], %s333_s25  ;;  %s2529_s16 = scalar_lea.vmem [#allocation5], %s1304_s28 }
  0xe2   : > { %1977 = dma.done.wait (%p2825_p0), %s334_s29, 512  }
  0xe3   : > { %1979 = vsyncadd (%p2825_p0), %s334_s29, 4294966784  ;;  %s2826_s5 = sld [smem:[#allocation22_spill]] }
  0xe4   : > { %s2827_s21 = sld [smem:[#allocation32_spill]] }
  0xe9   : > { %s344_s18 = sand.u32 1, %s2826_s5  }
  0xea   : > { %s1305_s6 = sshll.u32 %s344_s18, 7  ;;  %p2828_p11 = scmp.ne.s32.totalorder %s2827_s21, 0 }
  0xeb   : > { %s2536_s1 = scalar_lea.vmem [#allocation7], %s1305_s6 }
  0xec   : > { %1981 = dma.done.wait (%p2828_p11), %s334_s29, 2048  }
  0xed   : > { %1983 = vsyncadd (%p2828_p11), %s334_s29, 4294965248  ;;  %s352_s10 = scalar_lea.sflag [#allocation9], %s333_s25  ;;  %s2542_s30 = scalar_lea.vmem [#allocation8], %s1305_s6 }
  0xee   : > { %1985 = dma.done.wait (%p2828_p11), %s352_s10, 2048  }
  0xef   : > { %1987 = vsyncadd (%p2828_p11), %s352_s10, 4294965248  ;;  %s2829_s15 = sld [smem:[#allocation21_spill]] }
  0xf5   : > { %s362_s3 = sand.u32 1, %s2829_s15  }
  0xf6   : > { %s1307_s20 = sshll.u32 %s362_s3, 7 }
  0xf7   : > { %s2549_s14 = scalar_lea.vmem [#allocation10], %s1307_s20 }
  0xf8   : > { %1989 = dma.done.wait (%p2477_p3), %s352_s10, 2048  }
  0xf9   : > { %1991 = vsyncadd (%p2477_p3), %s352_s10, 4294965248  ;;  %v1660_v0 = vld [vmem:[%s2542_s30 + $0x40] sm:$0xff]   ;;  %v1662_v2 = vld [vmem:[%s2542_s30 + $0x48] sm:$0xff]   ;;  %v2074_v38 = vmov 0.0   ;;  %vm2075_vm0 = vmmov 0   ;;  %vm1018_vm1 = vcmask 261120  }
  0xfa   : > { %v1661_v1 = vld [vmem:[%s2542_s30] sm:$0xff]   ;;  %1402 = vmatprep.subr.bf16.mxu1 %v1660_v0  ;;  %v1663_v3 = vld [vmem:[%s2542_s30 + $0x8] sm:$0xff]   ;;  %v1664_v4 = vld [vmem:[%s2542_s30 + $0x50] sm:$0xff]   ;;  %s2830_s12 = sld [smem:[#allocation27_spill]]  ;;  %s2831_s26 = sld [smem:[#allocation26_spill]] }
  0xfb   : > { %1403 = vmatpush3.bf16.msra.mxu1 %v1661_v1  ;;  %v1665_v5 = vld [vmem:[%s2542_s30 + $0x10] sm:$0xff]   ;;  %v1667_v6 = vld [vmem:[%s2536_s1 + $0x40] sm:$0xff]   ;;  %v1666_v7 = vld [vmem:[%s2542_s30 + $0x58] sm:$0xff]   ;;  %s408_s13 = sand.u32 1, %s2002_s19   ;;  %s2832_s5 = sld [smem:[#allocation41_spill]] }
  0xfc   : > { %1404 = vmatprep.subr.bf16.mxu1 %v1662_v2  ;;  %1380 = vmatprep.subr.bf16.mxu0 %v1667_v6  ;;  %v1669_v8 = vld [vmem:[%s2536_s1] sm:$0xff]   ;;  %v1668_v9 = vld [vmem:[%s2542_s30 + $0x18] sm:$0xff]   ;;  %v1671_v10 = vld [vmem:[%s2536_s1 + $0x48] sm:$0xff]   ;;  %s1308_s24 = sshll.u32 %s408_s13, 3  ;;  %s2644_s18 = scalar_lea.sflag [#allocation4], %s408_s13 }
  0xfd   : > { %1381 = vmatpush3.bf16.msra.mxu0 %v1669_v8  ;;  %v1670_v11 = vld [vmem:[%s2542_s30 + $0x60] sm:$0xff]   ;;  %v1673_v12 = vld [vmem:[%s2536_s1 + $0x8] sm:$0xff]   ;;  %v1675_v14 = vld [vmem:[%s2536_s1 + $0x50] sm:$0xff]   ;;  %p2833_p4 = scmp.ne.s32.totalorder %s2799_s27, 0 }
  0xfe   : > { %1382 = vmatprep.subr.bf16.mxu0 %v1671_v10  ;;  %v1672_v13 = vld [vmem:[%s2542_s30 + $0x20] sm:$0xff]   ;;  %v1674_v15 = vld [vmem:[%s2542_s30 + $0x68] sm:$0xff]   ;;  %v1677_v16 = vld [vmem:[%s2536_s1 + $0x10] sm:$0xff]  }
  0xff   : > { %1405 = vmatpush3.bf16.msra.mxu1 %v1663_v3  ;;  %v1676_v17 = vld [vmem:[%s2542_s30 + $0x28] sm:$0xff]   ;;  %v1679_v18 = vld [vmem:[%s2536_s1 + $0x58] sm:$0xff]   ;;  %v1678_v19 = vld [vmem:[%s2542_s30 + $0x70] sm:$0xff]  }
 0x100   : > { %1406 = vmatprep.subr.bf16.mxu1 %v1664_v4  ;;  %v1681_v20 = vld [vmem:[%s2536_s1 + $0x18] sm:$0xff]   ;;  %v1680_v21 = vld [vmem:[%s2542_s30 + $0x30] sm:$0xff]   ;;  %v1683_v22 = vld [vmem:[%s2536_s1 + $0x60] sm:$0xff]   ;;  %s1367_s11 = sshll.u32 %s2830_s12, 2 }
 0x101   : > { %1383 = vmatpush3.bf16.msra.mxu0 %v1673_v12  ;;  %v1682_v23 = vld [vmem:[%s2542_s30 + $0x78] sm:$0xff]   ;;  %v1685_v24 = vld [vmem:[%s2536_s1 + $0x20] sm:$0xff]   ;;  %v1689_v28 = vld [vmem:[%s2536_s1 + $0x68] sm:$0xff]   ;;  %s1110_s22 = sadd.s32 %s2831_s26, %s1367_s11 }
 0x102   : > { %1384 = vmatprep.subr.bf16.mxu0 %v1675_v14  ;;  %v1684_v25 = vld [vmem:[%s2542_s30 + $0x38] sm:$0xff]   ;;  %v1688_v26 = vld [vmem:[%s2529_s16 + $0x4] ss:$8 sps:$4 sm:$0xff]   ;;  %v2583_v27 = vld [vmem:[%s2529_s16] ss:$8 sps:$4 sm:$0xff]   ;;  %s1368_s28 = sshll.u32 %s1110_s22, 6 }
 0x103   : > { %1407 = vmatpush3.bf16.msra.mxu1 %v1665_v5  ;;  %778 = vmatprep.mubr.bf16.mxu1 %v1688_v26  ;;  %v1690_v29 = vld [vmem:[%s2536_s1 + $0x28] sm:$0xff]   ;;  %v1691_v30 = vld [vmem:[%s2536_s1 + $0x70] sm:$0xff]   ;;  %v1696_v33 = vld [vmem:[%s2536_s1 + $0x78] sm:$0xff]   ;;  %s2642_s21 = scalar_lea.hbm %s2832_s5, %s1368_s28 }
 0x104   : > { %1408 = vmatprep.subr.bf16.mxu1 %v1666_v7  ;;  %v1692_v31 = vld [vmem:[%s2536_s1 + $0x30] sm:$0xff]   ;;  %v1697_v34 = vld [vmem:[%s2536_s1 + $0x38] sm:$0xff]   ;;  %v1701_v60 = vld [vmem:[%s2549_s14 + $0x40] sm:$0xff]   ;;  %s2076_s1 = smov [#allocation11]  }
 0x105   : > { %1385 = vmatpush3.bf16.msra.mxu0 %v1677_v16  ;;  %v2590_v32 = vld [vmem:[%s2529_s16 + $0x14] ss:$8 sps:$4 sm:$0xff]   ;;  %v2598_v36 = vld [vmem:[%s2529_s16 + $0x10] ss:$8 sps:$4 sm:$0xff]   ;;  %v1702_v61 = vld [vmem:[%s2549_s14] sm:$0xff]   ;;  %s1880_s10 = sshll.u32 %s2076_s1, 4  ;;  %s1881_s10 = int_to_ptr.vmem [resolvable:$false] %s1880_s10 }
 0x106   : > { %1386 = vmatprep.subr.bf16.mxu0 %v1679_v18  ;;  %v1700_v35 = vld [vmem:[%s2522_s7 + $0x4] ss:$8 sps:$4 sm:$0xff]   ;;  %v1698_v37 = vld [vmem:[%s2522_s7] ss:$8 sps:$4 sm:$0xff]   ;;  %s410_s7 = scalar_lea.vmem [#allocation11], %s1308_s24  ;;  %s1882_s30 = scalar_lea.vmem %s1881_s10, 256 }
 0x107   : > { %1409 = vmatpush3.bf16.msra.mxu1 %v1668_v9  ;;  %589 = vmatprep.mubr.bf16.mxu0 %v1700_v35  ;;  %v1703_v62 = vld [vmem:[%s2549_s14 + $0x48] sm:$0xff]   ;;  %v1705_v0 = vld [vmem:[%s2549_s14 + $0x50] sm:$0xff]   ;;  %v1707_v2 = vld [vmem:[%s2549_s14 + $0x58] sm:$0xff]   ;;  %s1113_s25 = sshll.u32 %s410_s7, 4  ;;  %s2637_s25 = int_to_ptr.vmem [resolvable:$true] %s1113_s25 }
 0x108   : > { %1410 = vmatprep.subr.bf16.mxu1 %v1670_v11  ;;  %v1704_v63 = vld [vmem:[%s2549_s14 + $0x8] sm:$0xff]   ;;  %v1706_v1 = vld [vmem:[%s2549_s14 + $0x10] sm:$0xff]   ;;  %v1708_v3 = vld [vmem:[%s2549_s14 + $0x18] sm:$0xff]   ;;  %s1876_s6 = scalar_lea.vmem %s2637_s25, 128  ;;  %p1883_p8 = scmp.lt.s32.totalorder %s2637_s25, %s1881_s10 }
 0x109   : > { %1387 = vmatpush3.bf16.msra.mxu0 %v1681_v20  ;;  %v1709_v4 = vld [vmem:[%s2549_s14 + $0x60] sm:$0xff]   ;;  %v1711_v6 = vld [vmem:[%s2549_s14 + $0x68] sm:$0xff]   ;;  %v1713_v8 = vld [vmem:[%s2549_s14 + $0x70] sm:$0xff]   ;;  %p1877_p3 = scmp.ne.s32.totalorder %s2637_s25, %s1876_s6  ;;  %p1884_p7 = scmp.lt.s32.totalorder %s1882_s30, %s1876_s6 }
 0x10a   : > { %1388 = vmatprep.subr.bf16.mxu0 %v1683_v22  ;;  %v1710_v5 = vld [vmem:[%s2549_s14 + $0x20] sm:$0xff]   ;;  %v1712_v7 = vld [vmem:[%s2549_s14 + $0x28] sm:$0xff]   ;;  %v1714_v9 = vld [vmem:[%s2549_s14 + $0x30] sm:$0xff]  }
 0x10b   : > { %1411 = vmatpush3.bf16.msra.mxu1 %v1672_v13  ;;  %v1715_v10 = vld [vmem:[%s2549_s14 + $0x78] sm:$0xff]   ;;  %p1878_p1 = pnand %p1877_p3, %p2833_p4  ;;  %p1885_p2 = por %p1884_p7, %p1883_p8 }
 0x10c   : > { %1412 = vmatprep.subr.bf16.mxu1 %v1674_v15  ;;  %v1716_v11 = vld [vmem:[%s2549_s14 + $0x38] sm:$0xff]  }
 0x10d   : > { %1389 = vmatpush3.bf16.msra.mxu0 %v1685_v24  ;;  %p1879_p9 = pneg %p1878_p1 }
 0x10e   : > { %1390 = vmatprep.subr.bf16.mxu0 %v1689_v28 }
 0x10f   : > { %1413 = vmatpush3.bf16.msra.mxu1 %v1676_v17  ;;  %p1886_p5 = pnand %p1885_p2, %p1879_p9 }
 0x110   : > { %1414 = vmatprep.subr.bf16.mxu1 %v1678_v19 }
 0x111   : > { %1391 = vmatpush3.bf16.msra.mxu0 %v1690_v29 }
 0x112   : > { %1392 = vmatprep.subr.bf16.mxu0 %v1691_v30 }
 0x113   : > { %1415 = vmatpush3.bf16.msra.mxu1 %v1680_v21 }
 0x114   : > { %1416 = vmatprep.subr.bf16.mxu1 %v1682_v23 }
 0x115   : > { %1393 = vmatpush3.bf16.msra.mxu0 %v1692_v31 }
 0x116   : > { %1394 = vmatprep.subr.bf16.mxu0 %v1696_v33 }
 0x117   : > { %1417 = vmatpush3.bf16.msra.mxu1 %v1684_v25 }
 0x118   : > { %1464 = vmatprep.subr.bf16.mxu1 %v2074_v38 }
 0x119   : > { %1395 = vmatpush3.bf16.msra.mxu0 %v1697_v34 }
 0x11a   : > { %779 = vmatmul.mubr.bf16.vlgmr.msra.gmra.mrb[0].mxu1 %v2583_v27  ;;  %1430 = vmatprep.subr.bf16.mxu0 %v1701_v60 }
 0x11b   : > { %786 = vmatprep.mubr.bf16.mxu1 %v2590_v32 }
 0x11c   : > { %590 = vmatmul.mubr.bf16.vlgmr.msra.gmra.mrb[0].mxu0 %v1698_v37 }
 0x11d   : > { %955 = vmatprep.mubr.bf16.mxu0 %v1688_v26  ;;  %1431 = vmatpush3.bf16.msra.mxu0 %v1702_v61 }
 0x11e   : > { %1432 = vmatprep.subr.bf16.mxu0 %v1703_v62 }
 0x121   : > { %1433 = vmatpush3.bf16.msra.mxu0 %v1704_v63 }
 0x122   : > { %787 = vmatmul.mubr.bf16.gmra.mrb[4].mxu1 %v2598_v36  ;;  %1434 = vmatprep.subr.bf16.mxu0 %v1705_v0 }
 0x123   : > { %1468 = vmatprep.mubr.msk.bf16.mxu1 %vm2075_vm0, %v2074_v38 }
 0x125   : > { %1435 = vmatpush3.bf16.msra.mxu0 %v1706_v1 }
 0x126   : > { %1436 = vmatprep.subr.bf16.mxu0 %v1707_v2 }
 0x129   : > { %1437 = vmatpush3.bf16.msra.mxu0 %v1708_v3 }
 0x12a   : > { %1438 = vmatprep.subr.bf16.mxu0 %v1709_v4 }
 0x12d   : > { %1439 = vmatpush3.bf16.msra.mxu0 %v1710_v5 }
 0x12e   : > { %1440 = vmatprep.subr.bf16.mxu0 %v1711_v6 }
 0x131   : > { %1441 = vmatpush3.bf16.msra.mxu0 %v1712_v7 }
 0x132   : > { %1442 = vmatprep.subr.bf16.mxu0 %v1713_v8 }
 0x135   : > { %1443 = vmatpush3.bf16.msra.mxu0 %v1714_v9 }
 0x136   : > { %1444 = vmatprep.subr.bf16.mxu0 %v1715_v10 }
 0x139   : > { %1445 = vmatpush3.bf16.msra.mxu0 %v1716_v11 }
 0x13c   : > { %956 = vmatmul.mubr.bf16.vlgmr.msra.gmra.mrb[4].mxu0 %v2583_v27 }
 0x13d   : > { %963 = vmatprep.mubr.bf16.mxu0 %v2590_v32 }
 0x144   : > { %964 = vmatmul.mubr.bf16.gmra.mrb[8].mxu0 %v2598_v36 }
 0x1ed   : > { %v1418_v39 = vpop.f32.mrb[0].mxu1 }
 0x1ee   : > { %v1419_v40 = vpop.f32.mrb[1].mxu1 }
 0x1ef   : > { %v1420_v41 = vadd.f32 %v1419_v40, %v1418_v39  ;;  %v1421_v42 = vpop.f32.mrb[2].mxu1  ;;  %v1396_v47 = vpop.f32.mrb[0].mxu0 }
 0x1f0   : > { %v1422_v43 = vpop.f32.mrb[3].mxu1  ;;  %v1397_v49 = vpop.f32.mrb[1].mxu0 }
 0x1f1   : > { %v1423_v44 = vadd.f32 %v1422_v43, %v1421_v42  ;;  %v1398_v52 = vadd.f32 %v1397_v49, %v1396_v47  ;;  %v1399_v53 = vpop.f32.mrb[2].mxu0 }
 0x1f2   : > { %v1400_v55 = vpop.f32.mrb[3].mxu0 }
 0x1f3   : > { %v973_v45 = vpack.c.bf16 %v1423_v44, %v1420_v41  ;;  %v1401_v57 = vadd.f32 %v1400_v55, %v1399_v53 }
 0x1f5   : > { %v1424_v46 = vpop.f32.mrb[4].mxu1  ;;  %1465 = vmatpush3.bf16.xpose.msra.mxu1 %v973_v45  ;;  %v972_v59 = vpack.c.bf16 %v1401_v57, %v1398_v52 }
 0x1f6   : > { %v1425_v48 = vpop.f32.mrb[5].mxu1  ;;  %1466 = vmatprep.subr.bf16.mxu1 %v2074_v38 }
 0x1f7   : > { %v1426_v50 = vadd.f32 %v1425_v48, %v1424_v46  ;;  %v1427_v51 = vpop.f32.mrb[6].mxu1 }
 0x1f8   : > { %v1428_v54 = vpop.f32.mrb[7].mxu1 }
 0x1f9   : > { %v1429_v56 = vadd.f32 %v1428_v54, %v1427_v51 }
 0x1fb   : > { %v974_v58 = vpack.c.bf16 %v1429_v56, %v1426_v50 }
 0x1fd   : > { %1467 = vmatpush3.bf16.xpose.msra.mxu1 %v974_v58 }
 0x1fe   : > { %1472 = vmatprep.subr.bf16.mxu1 %v2074_v38 }
 0x204   : > { %1469 = vmatmul.mubr.bf16.vlgmr.msra.gmra.mrb[8].mxu1 %v972_v59 }
 0x205   : > { %1476 = vmatprep.mubr.msk.bf16.mxu1 %vm2075_vm0, %v2074_v38 }
 0x20f   : > { %v1446_v20 = vpop.f32.mrb[4].mxu0 }
 0x210   : > { %v1447_v21 = vpop.f32.mrb[5].mxu0 }
 0x211   : > { %v1448_v22 = vadd.f32 %v1447_v21, %v1446_v20  ;;  %v1449_v23 = vpop.f32.mrb[6].mxu0 }
 0x212   : > { %v1450_v34 = vpop.f32.mrb[7].mxu0 }
 0x213   : > { %v1451_v35 = vadd.f32 %v1450_v34, %v1449_v23 }
 0x215   : > { %v1042_v36 = vpack.c.bf16 %v1451_v35, %v1448_v22 }
 0x217   : > { %v1452_v37 = vpop.f32.mrb[8].mxu0  ;;  %1473 = vmatpush3.bf16.msra.mxu1 %v1042_v36 }
 0x218   : > { %v1453_v39 = vpop.f32.mrb[9].mxu0  ;;  %1474 = vmatprep.subr.bf16.mxu1 %v2074_v38 }
 0x219   : > { %v1455_v40 = vpop.f32.mrb[10].mxu0  ;;  %v1454_v42 = vadd.f32 %v1453_v39, %v1452_v37 }
 0x21a   : > { %v1456_v41 = vpop.f32.mrb[11].mxu0 }
 0x21b   : > { %v1457_v43 = vadd.f32 %v1456_v41, %v1455_v40 }
 0x21d   : > { %v1043_v44 = vpack.c.bf16 %v1457_v43, %v1454_v42 }
 0x21f   : > { %1475 = vmatpush3.bf16.msra.mxu1 %v1043_v44 }
 0x2d7   : > { %v1009_v12 = vpop.f32.mrb[8].mxu1 }
 0x2d8   : > { %v1016_v13 = vmul.f32 0.088388346, %v1009_v12  ;;  %v1470_v14 = vpop.f32.mrb[9].mxu1 }
 0x2d9   : > { %v1012_v15 = vpop.f32.mrb[10].mxu1 }
 0x2da   : > { %v1017_v16 = vmul.f32 0.088388346, %v1012_v15  ;;  %v1471_v17 = vpop.f32.mrb[11].mxu1  ;;  %v1019_v18 = vsel %vm1018_vm1, %v1016_v13, -inf }
 0x2db   : > { %1020 = vmax.xlane.f32.xlu0 %v1019_v18 }
 0x2dc   : > { %v1022_v19 = vsel %vm1018_vm1, %v1017_v16, -inf }
 0x2df   : > { %1023 = vmax.xlane.f32.xlu0 %v1022_v19 }
 0x368   : > { %v1021_v24 = vpop.xlane.xlu0 %1020 }
 0x369   : > { %v1025_v25 = vsub.f32 %v1016_v13, %v1021_v24 }
 0x36b   : > { %v1027_v26 = vmul.f32 1.442695, %v1025_v25 }
 0x36c   : > { %v1024_v27 = vpop.xlane.xlu0 %1023 }
 0x36d   : > { %1717 = vpow2.f32 %v1027_v26  ;;  %v1026_v28 = vsub.f32 %v1017_v16, %v1024_v27 }
 0x36f   : > { %v1029_v29 = vmul.f32 1.442695, %v1026_v28 }
 0x371   : > { %1719 = vpow2.f32 %v1029_v29 }
 0x377   : > { %v1718_v30 = vpop.eup %1717 }
 0x378   : > { %v1031_v31 = vsel %vm1018_vm1, %v1718_v30, 0.0 }
 0x379   : > { %1032 = vadd.xlane.f32.xlu1 %v1031_v31 }
 0x37b   : > { %v1720_v32 = vpop.eup %1719 }
 0x37c   : > { %v1034_v33 = vsel %vm1018_vm1, %v1720_v32, 0.0 }
 0x37d   : > { %1035 = vadd.xlane.f32.xlu1 %v1034_v33 }
 0x406   : > { %v1033_v45 = vpop.xlane.xlu1 %1032 }
 0x407   : > { %1721 = vrcp.f32 %v1033_v45 }
 0x40a   : > { %v1036_v46 = vpop.xlane.xlu1 %1035 }
 0x40b   : > { %1723 = vrcp.f32 %v1036_v46 }
 0x411   : > { %v1722_v47 = vpop.eup %1721 }
 0x412   : > { %v1039_v49 = vmul.f32 %v1722_v47, %v1718_v30 }
 0x415   : > { %v1724_v48 = vpop.eup %1723 }
 0x416   : > { %v1040_v50 = vmul.f32 %v1724_v48, %v1720_v32 }
 0x418   : > { %v1041_v51 = vpack.c.bf16 %v1040_v50, %v1039_v49 }
 0x41a   : > { %1477 = vmatmul.mubr.msk.bf16.vlgmr.msra.gmra.mrb[12].mxu1 %vm1018_vm1, %v1041_v51 }
 0x4ed   : > { %v1081_v38 = vpop.f32.mrb[12].mxu1 }
 0x4ee   : > { %v1478_v52 = vpop.f32.mrb[13].mxu1 }
 0x4ef   : > { %v1084_v53 = vpop.f32.mrb[14].mxu1 }
 0x4f0   : > { %v1378_v54 = vpack.c.bf16 %v1084_v53, %v1081_v38  ;;  %v1479_v55 = vpop.f32.mrb[15].mxu1 }
 0x4f2   : > { %1379 = vst [vmem:[%s410_s7] sm:$0xff] %v1378_v54  }
 0x4f3   : > { %1889 = shalt.err (!%p1886_p5)
}
 0x4f4   : > { %s1890_s15 = scalar_lea.hbm %s2642_s21, 128  ;;  %s1894_s14 = scalar_lea.hbm %s2832_s5, 512 }
 0x4f5   : > { %p1891_p10 = scmp.ne.s32.totalorder %s2642_s21, %s1890_s15  ;;  %p1895_p12 = scmp.lt.u32.totalorder %s2642_s21, %s2832_s5 }
 0x4f6   : > { %p1896_p0 = scmp.lt.u32.totalorder %s1894_s14, %s1890_s15  ;;  %p1898_p3 = scmp.lt.u32.totalorder %s1890_s15, %s2642_s21 }
 0x4f7   : > { %p1892_p13 = pnand %p1891_p10, %p2833_p4 }
 0x4f8   : > { %p1897_p11 = por %p1896_p0, %p1895_p12 }
 0x4f9   : > { %p1893_p6 = pneg %p1892_p13 }
 0x4fa   : > { %p1899_p1 = por %p1898_p3, %p1897_p11 }
 0x4fc   : > { %p1900_p9 = pnand %p1899_p1, %p1893_p6 }
 0x4fe   : > { %1903 = shalt.err (!%p1900_p9)
}
 0x4ff   : > { %s2077_s13 = smov 64   ;;  %s2078_s24 = smov 128  }
 0x500   : > { %s2079_s11 = smov 4  }
 0x501   : > { %1490 = dma.vmem_to_hbm [thread:$0]  (%p2833_p4), %s2637_s25, 128, %s2642_s21, %s2644_s18, %s2077_s13, %s2078_s24, %s2079_s11  }
 0x502 PF: > { %s2834_s22 = sld [smem:[#allocation18_spill]]  ;;  %s2835_s7 = sld [smem:[#allocation37_spill]] }
 0x503   : > { %p1513_p8 = scmp.ge.s32.totalorder %s2062_s9, 2 }
 0x508   : > { %s1128_s28 = sand.u32 1, %s2834_s22   ;;  %p2836_p7 = scmp.ne.s32.totalorder %s2835_s7, 0 }
 0x509   : > { %s1129_s29 = scalar_lea.sflag [#allocation4], %s1128_s28 }
 0x50a   : > { %p1509_p2 = pnand %p1513_p8, %p2836_p7 }
 0x50c   : > { %1993 = dma.done.wait (!%p1509_p2), %s1129_s29, 128  }
 0x50d   : > { %1995 = vsyncadd (!%p1509_p2), %s1129_s29, 4294967168  ;;  %s27_s9 = sadd.s32 1, %s2062_s9   ;;  %s2838_s27 = sld [smem:[#allocation19_spill]] }
 0x50e   : > { %p2673_p5 = scmp.ge.s32.totalorder %s27_s9, 6   ;;  %s2839_s20 = sld [smem:[#allocation36_spill]] }
 0x50f   : > { %s2840_s21 = sld [smem:[#allocation21_spill]]  ;;  %s2841_s24 = sld [smem:[#allocation22_spill]] }
 0x510   : > { %s2842_s25 = sld [smem:[#allocation23_spill]]  ;;  %s2843_s26 = sld [smem:[#allocation34_spill]] }
 0x511   : > { %s2844_s6 = sld [smem:[#allocation24_spill]]  ;;  %s2845_s28 = sld [smem:[#allocation25_spill]] }
 0x512   : > { %s2846_s29 = sld [smem:[#allocation35_spill]]  ;;  %s2847_s30 = sld [smem:[#allocation28_spill]] }
 0x513   : > { %s2848_s7 = sld [smem:[#allocation31_spill]]  ;;  %s2849_s1 = sld [smem:[#allocation33_spill]] }
 0x514   : > { %s2850_s18 = smov %s2002_s19  ;;  %s2851_s19 = smov %s2838_s27 }
 0x515   : > { %s2852_s22 = smov %s2018_s23  ;;  %s2853_s23 = smov %s2462_s17 }
 0x516   :  { %26 = sbr.rel (!%p2673_p5) target bundleno = 21 (0x15), region = 133 }
 0x517   : > { %s2854_s27 = smov %s2844_s6  ;;  %s2855_s6 = smov %s2058_s8 }
 0x519   : > { %s2856_s8 = smov %s2849_s1 }
 0x51d   :  { %1134 = vsyncpa [#allocation3], 1 }
 0x51e   :  { %1136 = vsyncpa [#allocation3 + $0x1], 1 }
 0x51f   :  { %1137 = vsyncpa [#allocation6], 1 }
 0x520   :  { %1139 = vsyncpa [#allocation6 + $0x1], 1 }
 0x521   :  { %1140 = vsyncpa [#allocation9], 1 }
 0x522   :  { %1142 = vsyncpa [#allocation9 + $0x1], 1 }
 0x523   :  { %1143 = vsyncpa [#allocation4], 1 }
 0x524   :  { %1145 = vsyncpa [#allocation4 + $0x1], 1 }

</bundles_post_ra>
